<compile_context>
chip_gen: v7x
topology: tpu7x:2x2x1
jax: 0.10.0
libtpu: 0.0.40
codegen_flags: <defaults>
</compile_context>

<pallas_src>
import functools

import jax
import jax.numpy as jnp
from jax.experimental import pallas as pl
from jax.experimental.pallas import tpu as pltpu


def _round_up(a, b):
    return (a + b - 1) // b * b


def _gated_block(x_bf, v0, v1, v2, wvf, w1a, w1b, b1, w2, b2, *,
                 hin, hin_p, xout, xout_p, scalar_act):
    """One GatedEquivariantBlock on a tile; all operands already in VMEM/registers.

    x_bf       : (TM, hin)  bf16 scalar features
    v0, v1, v2 : (TM, hin)  bf16 vector features, one per spatial component
    wvf        : (hin, hin_p + vout) bf16, [vec1_proj | 0-pad | vec2_proj] with the
                 vec2 half starting on a 128-lane boundary (hin_p = round_up(hin,128))
    w1a, w1b   : (hin, I)   bf16 halves of update_net[0] weight ([x | vec1] split)
    b1         : (1, I)     f32
    w2         : (I, xout_p + vout) bf16, [xs | 0-pad | gate] (gate half 128-aligned)
    b2         : (1, xout_p + vout) f32
    Returns xs (TM, xout) f32 and three gated vector components (TM, vout) f32.
    """
    f32 = jnp.float32
    # vec1_proj + vec2_proj fused per spatial component (no sublane stacking).
    vp0 = jnp.dot(v0, wvf, preferred_element_type=f32)
    vp1 = jnp.dot(v1, wvf, preferred_element_type=f32)
    vp2 = jnp.dot(v2, wvf, preferred_element_type=f32)

    n0 = vp0[:, :hin]
    n1 = vp1[:, :hin]
    n2 = vp2[:, :hin]
    vec1 = jnp.sqrt(n0 * n0 + n1 * n1 + n2 * n2)                # (TM, hin) f32

    # update_net[0]: Linear(2*hin -> I) on concat([x, vec1]) == x@w1a + vec1@w1b
    h = (jnp.dot(x_bf, w1a, preferred_element_type=f32)
         + jnp.dot(vec1.astype(jnp.bfloat16), w1b, preferred_element_type=f32)
         + b1)
    h = h * jax.nn.sigmoid(h)                                   # SiLU (f32)

    o = jnp.dot(h.astype(jnp.bfloat16), w2, preferred_element_type=f32) + b2
    xs = o[:, :xout]
    gate = o[:, xout_p:]                                        # 128-aligned slice
    if scalar_act:
        xs = xs * jax.nn.sigmoid(xs)

    # Per-component gating -- no gate3 concat, no extra VMEM copies.
    return (xs,
            gate * vp0[:, hin_p:],
            gate * vp1[:, hin_p:],
            gate * vp2[:, hin_p:])


def _fused_kernel(x_ref, v_ref,
                  wvf1_ref, w1a1_ref, w1b1_ref, b11_ref, w21_ref, b21_ref,
                  wvf2_ref, w1a2_ref, w1b2_ref, b12_ref, w22_ref, b22_ref,
                  xo_ref, vo_ref, *,
                  hid1, hid1p, xo1, xo1p, hid2, hid2p, xo2, xo2p):
    x = x_ref[...]                                # (tm, hid1) bf16
    vflat = v_ref[...]                            # (tm, 3*hid1) bf16, lane-dense
    v0 = vflat[:, 0 * hid1:1 * hid1]
    v1 = vflat[:, 1 * hid1:2 * hid1]
    v2 = vflat[:, 2 * hid1:3 * hid1]

    # Block 1 (scalar_activation=True) -- intermediates stay in VMEM/registers.
    xs1, g0, g1, g2 = _gated_block(
        x, v0, v1, v2,
        wvf1_ref[...], w1a1_ref[...], w1b1_ref[...], b11_ref[...],
        w21_ref[...], b21_ref[...],
        hin=hid1, hin_p=hid1p, xout=xo1, xout_p=xo1p, scalar_act=True)

    # Block 2 (scalar_activation=False).
    xs2, u0, u1, u2 = _gated_block(
        xs1.astype(jnp.bfloat16),
        g0.astype(jnp.bfloat16), g1.astype(jnp.bfloat16), g2.astype(jnp.bfloat16),
        wvf2_ref[...], w1a2_ref[...], w1b2_ref[...], b12_ref[...],
        w22_ref[...], b22_ref[...],
        hin=hid2, hin_p=hid2p, xout=xo2, xout_p=xo2p, scalar_act=False)

    # Lane-dense outputs: (tm, xo2) and (tm, 3*vout2) laid out so the wrapper
    # reshape to (B, N, 3, vout2) is free. Single store per output ref.
    xo_ref[...] = xs2
    vo_ref[...] = jnp.concatenate([u0, u1, u2], axis=1)


def _pick_tm(m, target=512):
    """Token-tile size: large tiles amortize the ~0.35us per-step overhead; for
    small M still aim for >=2 grid steps so DMA pipelines / megacore shards."""
    if m > target:
        return target
    if m <= 8:
        return 8
    return _round_up((m + 1) // 2, 8)


def equivariant_scalar_forward(x, v, params1, params2):
    """x: (B, N, H), v: (B, N, 3, H) -> x:(B, N, x_out), v:(B, N, 3, v_out)."""
    B, N, H = x.shape
    M = B * N
    xf = x.reshape(M, H)                      # free
    vf = v.reshape(M, 3 * H)                  # free (contiguous), no HBM transpose

    wv11, wv21, w1a1, w1b1, b11, w21, b21 = params1
    wv12, wv22, w1a2, w1b2, b12, w22, b22 = params2

    H1 = H
    V1 = wv21.shape[1]
    X1 = w21.shape[1] - V1
    I1 = w1a1.shape[1]
    H2 = wv12.shape[0]
    V2 = wv22.shape[1]
    X2 = w22.shape[1] - V2
    I2 = w1a2.shape[1]

    # Lane padding so the vec2 / gate halves start on a 128-lane boundary
    # (no-op when H, x_out are already multiples of 128).
    H1p, X1p = _round_up(H1, 128), _round_up(X1, 128)
    H2p, X2p = _round_up(H2, 128), _round_up(X2, 128)

    bf16 = jnp.bfloat16
    wvf1 = jnp.concatenate(
        [jnp.pad(wv11, ((0, 0), (0, H1p - H1))), wv21], axis=1).astype(bf16)
    wvf2 = jnp.concatenate(
        [jnp.pad(wv12, ((0, 0), (0, H2p - H2))), wv22], axis=1).astype(bf16)
    w2p1 = jnp.concatenate(
        [jnp.pad(w21[:, :X1], ((0, 0), (0, X1p - X1))), w21[:, X1:]], axis=1).astype(bf16)
    w2p2 = jnp.concatenate(
        [jnp.pad(w22[:, :X2], ((0, 0), (0, X2p - X2))), w22[:, X2:]], axis=1).astype(bf16)
    b2p1 = jnp.concatenate(
        [jnp.pad(b21[:, :X1], ((0, 0), (0, X1p - X1))), b21[:, X1:]], axis=1)
    b2p2 = jnp.concatenate(
        [jnp.pad(b22[:, :X2], ((0, 0), (0, X2p - X2))), b22[:, X2:]], axis=1)
    w1a1b, w1b1b = w1a1.astype(bf16), w1b1.astype(bf16)
    w1a2b, w1b2b = w1a2.astype(bf16), w1b2.astype(bf16)

    # bf16 data streams into the MXU; halves HBM read traffic of the big v slab.
    xb = xf.astype(bf16)
    vb = vf.astype(bf16)

    tm = _pick_tm(M)
    steps = -(-M // tm)                       # cdiv
    m_pad = steps * tm
    if m_pad != M:                            # zero-pad rows (forward-safe: sqrt(0)=0)
        xb = jnp.pad(xb, ((0, m_pad - M), (0, 0)))
        vb = jnp.pad(vb, ((0, m_pad - M), (0, 0)))

    kernel = functools.partial(
        _fused_kernel,
        hid1=H1, hid1p=H1p, xo1=X1, xo1p=X1p,
        hid2=H2, hid2p=H2p, xo2=X2, xo2p=X2p)

    xo, vo = pl.pallas_call(
        kernel,
        out_shape=(jax.ShapeDtypeStruct((m_pad, X2), jnp.float32),
                   jax.ShapeDtypeStruct((m_pad, 3 * V2), jnp.float32)),
        grid_spec=pltpu.PrefetchScalarGridSpec(
            num_scalar_prefetch=0,
            grid=(steps,),
            in_specs=[
                pl.BlockSpec((tm, H1), lambda i: (i, 0)),          # x
                pl.BlockSpec((tm, 3 * H1), lambda i: (i, 0)),      # v (lane-dense slab)
                pl.BlockSpec((H1, H1p + V1), lambda i: (0, 0)),    # wvf1 (resident)
                pl.BlockSpec((H1, I1), lambda i: (0, 0)),          # w1a1
                pl.BlockSpec((H1, I1), lambda i: (0, 0)),          # w1b1
                pl.BlockSpec((1, I1), lambda i: (0, 0)),           # b11
                pl.BlockSpec((I1, X1p + V1), lambda i: (0, 0)),    # w21 ([xs|pad|gate])
                pl.BlockSpec((1, X1p + V1), lambda i: (0, 0)),     # b21
                pl.BlockSpec((H2, H2p + V2), lambda i: (0, 0)),    # wvf2
                pl.BlockSpec((H2, I2), lambda i: (0, 0)),          # w1a2
                pl.BlockSpec((H2, I2), lambda i: (0, 0)),          # w1b2
                pl.BlockSpec((1, I2), lambda i: (0, 0)),           # b12
                pl.BlockSpec((I2, X2p + V2), lambda i: (0, 0)),    # w22
                pl.BlockSpec((1, X2p + V2), lambda i: (0, 0)),     # b22
            ],
            out_specs=[
                pl.BlockSpec((tm, X2), lambda i: (i, 0)),
                pl.BlockSpec((tm, 3 * V2), lambda i: (i, 0)),
            ],
        ),
        compiler_params=pltpu.CompilerParams(
            dimension_semantics=("parallel",),
            vmem_limit_bytes=48 * 1024 * 1024),   # <= v7x 64 MiB physical VMEM
    )(xb, vb,
      wvf1, w1a1b, w1b1b, b11, w2p1, b2p1,
      wvf2, w1a2b, w1b2b, b12, w2p2, b2p2)

    if m_pad != M:
        xo, vo = xo[:M], vo[:M]
    return xo.reshape(B, N, X2), vo.reshape(B, N, 3, V2)


def make_block_params(key, hidden, x_out_ch, v_out_ch, intermediate=None):
    """Deterministic xavier-uniform weights, zero biases (matches reset_parameters)."""
    if intermediate is None:
        intermediate = hidden
    ks = jax.random.split(key, 4)

    def xavier(k, fan_in, fan_out):
        bound = (6.0 / (fan_in + fan_out)) ** 0.5
        # stored transposed w.r.t. PyTorch (in, out) so kernel does y = x @ W
        return jax.random.uniform(k, (fan_in, fan_out), jnp.float32, -bound, bound)

    wv1 = xavier(ks[0], hidden, hidden)                         # vec1_proj (no bias)
    wv2 = xavier(ks[1], hidden, v_out_ch)                       # vec2_proj (no bias)
    w1 = xavier(ks[2], 2 * hidden, intermediate)                # update_net[0]
    w1a, w1b = w1[:hidden], w1[hidden:]
    b1 = jnp.zeros((1, intermediate), jnp.float32)
    w2 = xavier(ks[3], intermediate, x_out_ch + v_out_ch)       # update_net[2]
    b2 = jnp.zeros((1, x_out_ch + v_out_ch), jnp.float32)
    return (wv1, wv2, w1a, w1b, b1, w2, b2)


# ---------------- pure-JAX reference (mirrors the PyTorch forward, f32) ----------------
def _ref_block(x, v, params, scalar_activation):
    wv1, wv2, w1a, w1b, b1, w2, b2 = params
    vec1_buffer = jnp.einsum('mdh,hk->mdk', v, wv1)              # (M, 3, H)
    vec1 = jnp.sqrt(jnp.sum(vec1_buffer * vec1_buffer, axis=1))  # norm over dim=-2
    vec2 = jnp.einsum('mdh,hk->mdk', v, wv2)                     # (M, 3, Vout)
    h = x @ w1a + vec1 @ w1b + b1
    h = h * jax.nn.sigmoid(h)
    out = h @ w2 + b2
    xout = w2.shape[1] - wv2.shape[1]
    xs, vs = out[:, :xout], out[:, xout:]
    if scalar_activation:
        xs = xs * jax.nn.sigmoid(xs)
    vnew = vs[:, None, :] * vec2
    return xs, vnew


def _ref_forward(x, v, params1, params2):
    B, N, H = x.shape
    M = B * N
    xf, vf = x.reshape(M, H), v.reshape(M, 3, H)
    x1, v1 = _ref_block(xf, vf, params1, True)
    x2, v2 = _ref_block(x1, v1, params2, False)
    return x2.reshape(B, N, -1), v2.reshape(B, N, 3, -1)


if __name__ == "__main__":
    key = jax.random.PRNGKey(0)
    k_x, k_v, k_p1, k_p2 = jax.random.split(key, 4)

    # EquivariantScalar(hidden_channels=32, x_out=4, v_out=4)
    B, N, H = 2, 8, 32
    X_OUT, V_OUT = 4, 4

    x = jax.random.normal(k_x, (B, N, H), jnp.float32)
    v = jax.random.normal(k_v, (B, N, 3, H), jnp.float32)

    params1 = make_block_params(k_p1, H, H // 2, H // 2)         # scalar_activation=True
    params2 = make_block_params(k_p2, H // 2, X_OUT, V_OUT)      # scalar_activation=False

    x_out, v_out = jax.jit(equivariant_scalar_forward)(x, v, params1, params2)
    jax.block_until_ready((x_out, v_out))

    # sanity vs. pure-JAX (f32) reference of the PyTorch semantics
    # (tolerance loosened because the kernel feeds bf16 into the MXU).
    x_exp, v_exp = _ref_forward(x, v, params1, params2)
    assert x_out.shape == (B, N, X_OUT) and v_out.shape == (B, N, 3, V_OUT)
    assert bool(jnp.allclose(x_out, x_exp, atol=5e-2, rtol=5e-2))
    assert bool(jnp.allclose(v_out, v_exp, atol=5e-2, rtol=5e-2))

    print("KERNEL_OK")
</pallas_src>

<mosaic_0001>
module attributes {stable_mosaic.version = 11 : i64} {
  func.func @_fused_kernel(%arg0: i32, %arg1: memref<8x32xbf16, #tpu.memory_space<vmem>>, %arg2: memref<8x96xbf16, #tpu.memory_space<vmem>>, %arg3: memref<32x144xbf16, #tpu.memory_space<vmem>>, %arg4: memref<32x32xbf16, #tpu.memory_space<vmem>>, %arg5: memref<32x32xbf16, #tpu.memory_space<vmem>>, %arg6: memref<1x32xf32, #tpu.memory_space<vmem>>, %arg7: memref<32x144xbf16, #tpu.memory_space<vmem>>, %arg8: memref<1x144xf32, #tpu.memory_space<vmem>>, %arg9: memref<16x132xbf16, #tpu.memory_space<vmem>>, %arg10: memref<16x16xbf16, #tpu.memory_space<vmem>>, %arg11: memref<16x16xbf16, #tpu.memory_space<vmem>>, %arg12: memref<1x16xf32, #tpu.memory_space<vmem>>, %arg13: memref<16x132xbf16, #tpu.memory_space<vmem>>, %arg14: memref<1x132xf32, #tpu.memory_space<vmem>>, %arg15: memref<8x4xf32, #tpu.memory_space<vmem>>, %arg16: memref<8x12xf32, #tpu.memory_space<vmem>>) attributes {dimension_semantics = [#tpu.dimension_semantics<parallel>], iteration_bounds = array<i64: 2>, scalar_prefetch = 0 : i64, scratch_operands = 0 : i64, tpu.core_type = #tpu.core_type<tc>, window_params = [{transform_indices = @transform_0, window_bounds = array<i64: 8, 32>}, {transform_indices = @transform_1, window_bounds = array<i64: 8, 96>}, {pipeline_mode = #tpu.pipeline_mode<synchronous>, transform_indices = @transform_2, window_bounds = array<i64: 32, 144>}, {pipeline_mode = #tpu.pipeline_mode<synchronous>, transform_indices = @transform_3, window_bounds = array<i64: 32, 32>}, {pipeline_mode = #tpu.pipeline_mode<synchronous>, transform_indices = @transform_4, window_bounds = array<i64: 32, 32>}, {pipeline_mode = #tpu.pipeline_mode<synchronous>, transform_indices = @transform_5, window_bounds = array<i64: 1, 32>}, {pipeline_mode = #tpu.pipeline_mode<synchronous>, transform_indices = @transform_6, window_bounds = array<i64: 32, 144>}, {pipeline_mode = #tpu.pipeline_mode<synchronous>, transform_indices = @transform_7, window_bounds = array<i64: 1, 144>}, {pipeline_mode = #tpu.pipeline_mode<synchronous>, transform_indices = @transform_8, window_bounds = array<i64: 16, 132>}, {pipeline_mode = #tpu.pipeline_mode<synchronous>, transform_indices = @transform_9, window_bounds = array<i64: 16, 16>}, {pipeline_mode = #tpu.pipeline_mode<synchronous>, transform_indices = @transform_10, window_bounds = array<i64: 16, 16>}, {pipeline_mode = #tpu.pipeline_mode<synchronous>, transform_indices = @transform_11, window_bounds = array<i64: 1, 16>}, {pipeline_mode = #tpu.pipeline_mode<synchronous>, transform_indices = @transform_12, window_bounds = array<i64: 16, 132>}, {pipeline_mode = #tpu.pipeline_mode<synchronous>, transform_indices = @transform_13, window_bounds = array<i64: 1, 132>}, {transform_indices = @transform_14, window_bounds = array<i64: 8, 4>}, {transform_indices = @transform_15, window_bounds = array<i64: 8, 12>}]} {
    %c0 = arith.constant 0 : index
    %c0_0 = arith.constant 0 : index
    %0 = vector.load %arg1[%c0, %c0_0] : memref<8x32xbf16, #tpu.memory_space<vmem>>, vector<8x32xbf16>
    %c0_1 = arith.constant 0 : index
    %c0_2 = arith.constant 0 : index
    %1 = vector.load %arg2[%c0_1, %c0_2] : memref<8x96xbf16, #tpu.memory_space<vmem>>, vector<8x96xbf16>
    %2 = vector.extract_strided_slice %1 {offsets = [0, 0], sizes = [8, 32], strides = [1, 1]} : vector<8x96xbf16> to vector<8x32xbf16>
    %3 = vector.extract_strided_slice %1 {offsets = [0, 32], sizes = [8, 32], strides = [1, 1]} : vector<8x96xbf16> to vector<8x32xbf16>
    %4 = vector.extract_strided_slice %1 {offsets = [0, 64], sizes = [8, 32], strides = [1, 1]} : vector<8x96xbf16> to vector<8x32xbf16>
    %c0_3 = arith.constant 0 : index
    %c0_4 = arith.constant 0 : index
    %5 = vector.load %arg3[%c0_3, %c0_4] : memref<32x144xbf16, #tpu.memory_space<vmem>>, vector<32x144xbf16>
    %c0_5 = arith.constant 0 : index
    %c0_6 = arith.constant 0 : index
    %6 = vector.load %arg4[%c0_5, %c0_6] : memref<32x32xbf16, #tpu.memory_space<vmem>>, vector<32x32xbf16>
    %c0_7 = arith.constant 0 : index
    %c0_8 = arith.constant 0 : index
    %7 = vector.load %arg5[%c0_7, %c0_8] : memref<32x32xbf16, #tpu.memory_space<vmem>>, vector<32x32xbf16>
    %c0_9 = arith.constant 0 : index
    %c0_10 = arith.constant 0 : index
    %8 = vector.load %arg6[%c0_9, %c0_10] : memref<1x32xf32, #tpu.memory_space<vmem>>, vector<1x32xf32>
    %c0_11 = arith.constant 0 : index
    %c0_12 = arith.constant 0 : index
    %9 = vector.load %arg7[%c0_11, %c0_12] : memref<32x144xbf16, #tpu.memory_space<vmem>>, vector<32x144xbf16>
    %c0_13 = arith.constant 0 : index
    %c0_14 = arith.constant 0 : index
    %10 = vector.load %arg8[%c0_13, %c0_14] : memref<1x144xf32, #tpu.memory_space<vmem>>, vector<1x144xf32>
    %cst = arith.constant dense<0.000000e+00> : vector<8x144xf32>
    %11 = tpu.matmul %2, %5, %cst {dimension_numbers = #tpu.dot_dimension_numbers<[1], [0], [0], [1], [0, 0, 1, 1], [], []>} : vector<8x32xbf16>, vector<32x144xbf16>, vector<8x144xf32> -> vector<8x144xf32>
    %cst_15 = arith.constant dense<0.000000e+00> : vector<8x144xf32>
    %12 = tpu.matmul %3, %5, %cst_15 {dimension_numbers = #tpu.dot_dimension_numbers<[1], [0], [0], [1], [0, 0, 1, 1], [], []>} : vector<8x32xbf16>, vector<32x144xbf16>, vector<8x144xf32> -> vector<8x144xf32>
    %cst_16 = arith.constant dense<0.000000e+00> : vector<8x144xf32>
    %13 = tpu.matmul %4, %5, %cst_16 {dimension_numbers = #tpu.dot_dimension_numbers<[1], [0], [0], [1], [0, 0, 1, 1], [], []>} : vector<8x32xbf16>, vector<32x144xbf16>, vector<8x144xf32> -> vector<8x144xf32>
    %14 = vector.extract_strided_slice %11 {offsets = [0, 0], sizes = [8, 32], strides = [1, 1]} : vector<8x144xf32> to vector<8x32xf32>
    %15 = vector.extract_strided_slice %12 {offsets = [0, 0], sizes = [8, 32], strides = [1, 1]} : vector<8x144xf32> to vector<8x32xf32>
    %16 = vector.extract_strided_slice %13 {offsets = [0, 0], sizes = [8, 32], strides = [1, 1]} : vector<8x144xf32> to vector<8x32xf32>
    %17 = arith.mulf %14, %14 : vector<8x32xf32>
    %18 = arith.mulf %15, %15 : vector<8x32xf32>
    %19 = arith.addf %17, %18 : vector<8x32xf32>
    %20 = arith.mulf %16, %16 : vector<8x32xf32>
    %21 = arith.addf %19, %20 : vector<8x32xf32>
    %22 = math.sqrt %21 : vector<8x32xf32>
    %cst_17 = arith.constant dense<0.000000e+00> : vector<8x32xf32>
    %23 = tpu.matmul %0, %6, %cst_17 {dimension_numbers = #tpu.dot_dimension_numbers<[1], [0], [0], [1], [0, 0, 1, 1], [], []>} : vector<8x32xbf16>, vector<32x32xbf16>, vector<8x32xf32> -> vector<8x32xf32>
    %24 = arith.truncf %22 : vector<8x32xf32> to vector<8x32xbf16>
    %cst_18 = arith.constant dense<0.000000e+00> : vector<8x32xf32>
    %25 = tpu.matmul %24, %7, %cst_18 {dimension_numbers = #tpu.dot_dimension_numbers<[1], [0], [0], [1], [0, 0, 1, 1], [], []>} : vector<8x32xbf16>, vector<32x32xbf16>, vector<8x32xf32> -> vector<8x32xf32>
    %26 = arith.addf %23, %25 : vector<8x32xf32>
    %27 = vector.broadcast %8 : vector<1x32xf32> to vector<8x32xf32>
    %28 = arith.addf %26, %27 : vector<8x32xf32>
    %29 = arith.negf %28 : vector<8x32xf32>
    %30 = math.exp %29 : vector<8x32xf32>
    %cst_19 = arith.constant 1.000000e+00 : f32
    %31 = vector.broadcast %cst_19 : f32 to vector<8x32xf32>
    %32 = arith.addf %31, %30 : vector<8x32xf32>
    %33 = arith.divf %31, %32 : vector<8x32xf32>
    %34 = arith.mulf %28, %33 : vector<8x32xf32>
    %35 = arith.truncf %34 : vector<8x32xf32> to vector<8x32xbf16>
    %cst_20 = arith.constant dense<0.000000e+00> : vector<8x144xf32>
    %36 = tpu.matmul %35, %9, %cst_20 {dimension_numbers = #tpu.dot_dimension_numbers<[1], [0], [0], [1], [0, 0, 1, 1], [], []>} : vector<8x32xbf16>, vector<32x144xbf16>, vector<8x144xf32> -> vector<8x144xf32>
    %37 = vector.broadcast %10 : vector<1x144xf32> to vector<8x144xf32>
    %38 = arith.addf %36, %37 : vector<8x144xf32>
    %39 = vector.extract_strided_slice %38 {offsets = [0, 0], sizes = [8, 16], strides = [1, 1]} : vector<8x144xf32> to vector<8x16xf32>
    %40 = vector.extract_strided_slice %38 {offsets = [0, 128], sizes = [8, 16], strides = [1, 1]} : vector<8x144xf32> to vector<8x16xf32>
    %41 = arith.negf %39 : vector<8x16xf32>
    %42 = math.exp %41 : vector<8x16xf32>
    %cst_21 = arith.constant 1.000000e+00 : f32
    %43 = vector.broadcast %cst_21 : f32 to vector<8x16xf32>
    %44 = arith.addf %43, %42 : vector<8x16xf32>
    %45 = arith.divf %43, %44 : vector<8x16xf32>
    %46 = arith.mulf %39, %45 : vector<8x16xf32>
    %47 = vector.extract_strided_slice %11 {offsets = [0, 128], sizes = [8, 16], strides = [1, 1]} : vector<8x144xf32> to vector<8x16xf32>
    %48 = arith.mulf %40, %47 : vector<8x16xf32>
    %49 = vector.extract_strided_slice %12 {offsets = [0, 128], sizes = [8, 16], strides = [1, 1]} : vector<8x144xf32> to vector<8x16xf32>
    %50 = arith.mulf %40, %49 : vector<8x16xf32>
    %51 = vector.extract_strided_slice %13 {offsets = [0, 128], sizes = [8, 16], strides = [1, 1]} : vector<8x144xf32> to vector<8x16xf32>
    %52 = arith.mulf %40, %51 : vector<8x16xf32>
    %53 = arith.truncf %46 : vector<8x16xf32> to vector<8x16xbf16>
    %54 = arith.truncf %48 : vector<8x16xf32> to vector<8x16xbf16>
    %55 = arith.truncf %50 : vector<8x16xf32> to vector<8x16xbf16>
    %56 = arith.truncf %52 : vector<8x16xf32> to vector<8x16xbf16>
    %c0_22 = arith.constant 0 : index
    %c0_23 = arith.constant 0 : index
    %57 = vector.load %arg9[%c0_22, %c0_23] : memref<16x132xbf16, #tpu.memory_space<vmem>>, vector<16x132xbf16>
    %c0_24 = arith.constant 0 : index
    %c0_25 = arith.constant 0 : index
    %58 = vector.load %arg10[%c0_24, %c0_25] : memref<16x16xbf16, #tpu.memory_space<vmem>>, vector<16x16xbf16>
    %c0_26 = arith.constant 0 : index
    %c0_27 = arith.constant 0 : index
    %59 = vector.load %arg11[%c0_26, %c0_27] : memref<16x16xbf16, #tpu.memory_space<vmem>>, vector<16x16xbf16>
    %c0_28 = arith.constant 0 : index
    %c0_29 = arith.constant 0 : index
    %60 = vector.load %arg12[%c0_28, %c0_29] : memref<1x16xf32, #tpu.memory_space<vmem>>, vector<1x16xf32>
    %c0_30 = arith.constant 0 : index
    %c0_31 = arith.constant 0 : index
    %61 = vector.load %arg13[%c0_30, %c0_31] : memref<16x132xbf16, #tpu.memory_space<vmem>>, vector<16x132xbf16>
    %c0_32 = arith.constant 0 : index
    %c0_33 = arith.constant 0 : index
    %62 = vector.load %arg14[%c0_32, %c0_33] : memref<1x132xf32, #tpu.memory_space<vmem>>, vector<1x132xf32>
    %cst_34 = arith.constant dense<0.000000e+00> : vector<8x132xf32>
    %63 = tpu.matmul %54, %57, %cst_34 {dimension_numbers = #tpu.dot_dimension_numbers<[1], [0], [0], [1], [0, 0, 1, 1], [], []>} : vector<8x16xbf16>, vector<16x132xbf16>, vector<8x132xf32> -> vector<8x132xf32>
    %cst_35 = arith.constant dense<0.000000e+00> : vector<8x132xf32>
    %64 = tpu.matmul %55, %57, %cst_35 {dimension_numbers = #tpu.dot_dimension_numbers<[1], [0], [0], [1], [0, 0, 1, 1], [], []>} : vector<8x16xbf16>, vector<16x132xbf16>, vector<8x132xf32> -> vector<8x132xf32>
    %cst_36 = arith.constant dense<0.000000e+00> : vector<8x132xf32>
    %65 = tpu.matmul %56, %57, %cst_36 {dimension_numbers = #tpu.dot_dimension_numbers<[1], [0], [0], [1], [0, 0, 1, 1], [], []>} : vector<8x16xbf16>, vector<16x132xbf16>, vector<8x132xf32> -> vector<8x132xf32>
    %66 = vector.extract_strided_slice %63 {offsets = [0, 0], sizes = [8, 16], strides = [1, 1]} : vector<8x132xf32> to vector<8x16xf32>
    %67 = vector.extract_strided_slice %64 {offsets = [0, 0], sizes = [8, 16], strides = [1, 1]} : vector<8x132xf32> to vector<8x16xf32>
    %68 = vector.extract_strided_slice %65 {offsets = [0, 0], sizes = [8, 16], strides = [1, 1]} : vector<8x132xf32> to vector<8x16xf32>
    %69 = arith.mulf %66, %66 : vector<8x16xf32>
    %70 = arith.mulf %67, %67 : vector<8x16xf32>
    %71 = arith.addf %69, %70 : vector<8x16xf32>
    %72 = arith.mulf %68, %68 : vector<8x16xf32>
    %73 = arith.addf %71, %72 : vector<8x16xf32>
    %74 = math.sqrt %73 : vector<8x16xf32>
    %cst_37 = arith.constant dense<0.000000e+00> : vector<8x16xf32>
    %75 = tpu.matmul %53, %58, %cst_37 {dimension_numbers = #tpu.dot_dimension_numbers<[1], [0], [0], [1], [0, 0, 1, 1], [], []>} : vector<8x16xbf16>, vector<16x16xbf16>, vector<8x16xf32> -> vector<8x16xf32>
    %76 = arith.truncf %74 : vector<8x16xf32> to vector<8x16xbf16>
    %cst_38 = arith.constant dense<0.000000e+00> : vector<8x16xf32>
    %77 = tpu.matmul %76, %59, %cst_38 {dimension_numbers = #tpu.dot_dimension_numbers<[1], [0], [0], [1], [0, 0, 1, 1], [], []>} : vector<8x16xbf16>, vector<16x16xbf16>, vector<8x16xf32> -> vector<8x16xf32>
    %78 = arith.addf %75, %77 : vector<8x16xf32>
    %79 = vector.broadcast %60 : vector<1x16xf32> to vector<8x16xf32>
    %80 = arith.addf %78, %79 : vector<8x16xf32>
    %81 = arith.negf %80 : vector<8x16xf32>
    %82 = math.exp %81 : vector<8x16xf32>
    %cst_39 = arith.constant 1.000000e+00 : f32
    %83 = vector.broadcast %cst_39 : f32 to vector<8x16xf32>
    %84 = arith.addf %83, %82 : vector<8x16xf32>
    %85 = arith.divf %83, %84 : vector<8x16xf32>
    %86 = arith.mulf %80, %85 : vector<8x16xf32>
    %87 = arith.truncf %86 : vector<8x16xf32> to vector<8x16xbf16>
    %cst_40 = arith.constant dense<0.000000e+00> : vector<8x132xf32>
    %88 = tpu.matmul %87, %61, %cst_40 {dimension_numbers = #tpu.dot_dimension_numbers<[1], [0], [0], [1], [0, 0, 1, 1], [], []>} : vector<8x16xbf16>, vector<16x132xbf16>, vector<8x132xf32> -> vector<8x132xf32>
    %89 = vector.broadcast %62 : vector<1x132xf32> to vector<8x132xf32>
    %90 = arith.addf %88, %89 : vector<8x132xf32>
    %91 = vector.extract_strided_slice %90 {offsets = [0, 0], sizes = [8, 4], strides = [1, 1]} : vector<8x132xf32> to vector<8x4xf32>
    %92 = vector.extract_strided_slice %90 {offsets = [0, 128], sizes = [8, 4], strides = [1, 1]} : vector<8x132xf32> to vector<8x4xf32>
    %93 = vector.extract_strided_slice %63 {offsets = [0, 128], sizes = [8, 4], strides = [1, 1]} : vector<8x132xf32> to vector<8x4xf32>
    %94 = arith.mulf %92, %93 : vector<8x4xf32>
    %95 = vector.extract_strided_slice %64 {offsets = [0, 128], sizes = [8, 4], strides = [1, 1]} : vector<8x132xf32> to vector<8x4xf32>
    %96 = arith.mulf %92, %95 : vector<8x4xf32>
    %97 = vector.extract_strided_slice %65 {offsets = [0, 128], sizes = [8, 4], strides = [1, 1]} : vector<8x132xf32> to vector<8x4xf32>
    %98 = arith.mulf %92, %97 : vector<8x4xf32>
    %c0_41 = arith.constant 0 : index
    %c0_42 = arith.constant 0 : index
    %99 = vector.load %arg15[%c0_41, %c0_42] : memref<8x4xf32, #tpu.memory_space<vmem>>, vector<8x4xf32>
    tpu.vector_store %arg15[%c0_41, %c0_42], %91 {strides = array<i32>} : memref<8x4xf32, #tpu.memory_space<vmem>>, vector<8x4xf32>,
    %100 = tpu.concatenate %94, %96, %98 in 1 : vector<8x4xf32>, vector<8x4xf32>, vector<8x4xf32> -> vector<8x12xf32>
    %c0_43 = arith.constant 0 : index
    %c0_44 = arith.constant 0 : index
    %101 = vector.load %arg16[%c0_43, %c0_44] : memref<8x12xf32, #tpu.memory_space<vmem>>, vector<8x12xf32>
    tpu.vector_store %arg16[%c0_43, %c0_44], %100 {strides = array<i32>} : memref<8x12xf32, #tpu.memory_space<vmem>>, vector<8x12xf32>,
    return
  }
  func.func @transform_0(%arg0: i32) -> (i32, i32) {
    %c0_i32 = arith.constant 0 : i32
    %c0_i32_0 = arith.constant 0 : i32
    return %arg0, %c0_i32 : i32, i32
  }
  func.func @transform_1(%arg0: i32) -> (i32, i32) {
    %c0_i32 = arith.constant 0 : i32
    %c0_i32_0 = arith.constant 0 : i32
    return %arg0, %c0_i32 : i32, i32
  }
  func.func @transform_2(%arg0: i32) -> (i32, i32) {
    %c0_i32 = arith.constant 0 : i32
    %c0_i32_0 = arith.constant 0 : i32
    %c0_i32_1 = arith.constant 0 : i32
    return %c0_i32, %c0_i32_0 : i32, i32
  }
  func.func @transform_3(%arg0: i32) -> (i32, i32) {
    %c0_i32 = arith.constant 0 : i32
    %c0_i32_0 = arith.constant 0 : i32
    %c0_i32_1 = arith.constant 0 : i32
    return %c0_i32, %c0_i32_0 : i32, i32
  }
  func.func @transform_4(%arg0: i32) -> (i32, i32) {
    %c0_i32 = arith.constant 0 : i32
    %c0_i32_0 = arith.constant 0 : i32
    %c0_i32_1 = arith.constant 0 : i32
    return %c0_i32, %c0_i32_0 : i32, i32
  }
  func.func @transform_5(%arg0: i32) -> (i32, i32) {
    %c0_i32 = arith.constant 0 : i32
    %c0_i32_0 = arith.constant 0 : i32
    %c0_i32_1 = arith.constant 0 : i32
    return %c0_i32, %c0_i32_0 : i32, i32
  }
  func.func @transform_6(%arg0: i32) -> (i32, i32) {
    %c0_i32 = arith.constant 0 : i32
    %c0_i32_0 = arith.constant 0 : i32
    %c0_i32_1 = arith.constant 0 : i32
    return %c0_i32, %c0_i32_0 : i32, i32
  }
  func.func @transform_7(%arg0: i32) -> (i32, i32) {
    %c0_i32 = arith.constant 0 : i32
    %c0_i32_0 = arith.constant 0 : i32
    %c0_i32_1 = arith.constant 0 : i32
    return %c0_i32, %c0_i32_0 : i32, i32
  }
  func.func @transform_8(%arg0: i32) -> (i32, i32) {
    %c0_i32 = arith.constant 0 : i32
    %c0_i32_0 = arith.constant 0 : i32
    %c0_i32_1 = arith.constant 0 : i32
    return %c0_i32, %c0_i32_0 : i32, i32
  }
  func.func @transform_9(%arg0: i32) -> (i32, i32) {
    %c0_i32 = arith.constant 0 : i32
    %c0_i32_0 = arith.constant 0 : i32
    %c0_i32_1 = arith.constant 0 : i32
    return %c0_i32, %c0_i32_0 : i32, i32
  }
  func.func @transform_10(%arg0: i32) -> (i32, i32) {
    %c0_i32 = arith.constant 0 : i32
    %c0_i32_0 = arith.constant 0 : i32
    %c0_i32_1 = arith.constant 0 : i32
    return %c0_i32, %c0_i32_0 : i32, i32
  }
  func.func @transform_11(%arg0: i32) -> (i32, i32) {
    %c0_i32 = arith.constant 0 : i32
    %c0_i32_0 = arith.constant 0 : i32
    %c0_i32_1 = arith.constant 0 : i32
    return %c0_i32, %c0_i32_0 : i32, i32
  }
  func.func @transform_12(%arg0: i32) -> (i32, i32) {
    %c0_i32 = arith.constant 0 : i32
    %c0_i32_0 = arith.constant 0 : i32
    %c0_i32_1 = arith.constant 0 : i32
    return %c0_i32, %c0_i32_0 : i32, i32
  }
  func.func @transform_13(%arg0: i32) -> (i32, i32) {
    %c0_i32 = arith.constant 0 : i32
    %c0_i32_0 = arith.constant 0 : i32
    %c0_i32_1 = arith.constant 0 : i32
    return %c0_i32, %c0_i32_0 : i32, i32
  }
  func.func @transform_14(%arg0: i32) -> (i32, i32) {
    %c0_i32 = arith.constant 0 : i32
    %c0_i32_0 = arith.constant 0 : i32
    return %arg0, %c0_i32 : i32, i32
  }
  func.func @transform_15(%arg0: i32) -> (i32, i32) {
    %c0_i32 = arith.constant 0 : i32
    %c0_i32_0 = arith.constant 0 : i32
    return %arg0, %c0_i32 : i32, i32
  }
}

</mosaic_0001>

<bundles_post_ra>
// kernel: equivariant_scalar_forward.1
= control target key start
LH: loop header
LB: loop body
LE: loop exit
PB: predicated region body
PF: predicated region fallthrough
CT: control target
= control target key end

     0   :  { %s1620_s18 = smov 0   ;;  %s1774_s0 = inlined_call_operand.vmem [shape: bf16[16,32], index: 0, kind: input, shape index: {}]   ;;  %s1775_s1 = inlined_call_operand.vmem [shape: bf16[16,96], index: 1, kind: input, shape index: {}]   ;;  %s1776_s2 = inlined_call_operand.vmem [shape: bf16[32,144], index: 2, kind: input, shape index: {}]   ;;  %s1777_s3 = inlined_call_operand.vmem [shape: bf16[32,32], index: 3, kind: input, shape index: {}]   ;;  %s1778_s4 = inlined_call_operand.vmem [shape: bf16[32,32], index: 4, kind: input, shape index: {}]   ;;  %s1779_s5 = inlined_call_operand.vmem [shape: f32[1,32], index: 5, kind: input, shape index: {}]   ;;  %s1780_s6 = inlined_call_operand.vmem [shape: bf16[32,144], index: 6, kind: input, shape index: {}]   ;;  %s1781_s7 = inlined_call_operand.vmem [shape: f32[1,144], index: 7, kind: input, shape index: {}]   ;;  %s1782_s8 = inlined_call_operand.vmem [shape: bf16[16,132], index: 8, kind: input, shape index: {}]   ;;  %s1783_s9 = inlined_call_operand.vmem [shape: bf16[16,16], index: 9, kind: input, shape index: {}]   ;;  %s1784_s10 = inlined_call_operand.vmem [shape: bf16[16,16], index: 10, kind: input, shape index: {}]   ;;  %s1785_s11 = inlined_call_operand.vmem [shape: f32[1,16], index: 11, kind: input, shape index: {}]   ;;  %s1786_s12 = inlined_call_operand.vmem [shape: bf16[16,132], index: 12, kind: input, shape index: {}]   ;;  %s1787_s13 = inlined_call_operand.vmem [shape: f32[1,132], index: 13, kind: input, shape index: {}]   ;;  %s1788_s14 = inlined_call_operand.vmem [shape: f32[16,4], index: 14, kind: output, shape index: {0}]   ;;  %s1789_s15 = inlined_call_operand.vmem [shape: f32[16,12], index: 15, kind: output, shape index: {1}]  }
   0x1 LB: > { %s1384_s19 = sadd.s32 4294967295, %s1531_s18   ;;  %p1388_p0 = scmp.ge.s32.totalorder %s1531_s18, 1  ;;  %s1531_s18 = sphi %s1620_s18, %s26_s18  }
   0x2   : > { %p448_p1 = scmp.lt.s32.totalorder %s1531_s18, 3 }
   0x4   : > { %p449_p2 = pnand %p1388_p0, %p448_p1 }
   0x5   : > { %p502_p3 = scmp.lt.s32.totalorder (!%p449_p2), %s1384_s19, 1  ;;  %v1485_v0 = vld [vmem:[%s1776_s2 + $0x4] ss:$8 sps:$4 sm:$0xff] (!%p449_p2)   ;;  %v1487_v1 = vld [vmem:[%s1776_s2] ss:$8 sps:$4 sm:$0xff] (!%p449_p2)   ;;  %v1533_v4 = vmov (!%p449_p2), 0   ;;  %v838_v61 = vlaneseq (!%p449_p2) }
   0x6   : > { %452 = sbr.rel (%p449_p2) target bundleno = 1661 (0x67d), region = 76  ;;  %563 = vmatprep.subr.bf16.mxu0 (!%p449_p2), %v1485_v0  ;;  %v1488_v2 = vld [vmem:[%s1776_s2 + $0x14] ss:$8 sps:$4 sm:$0xff] (!%p449_p2)   ;;  %v1490_v3 = vld [vmem:[%s1776_s2 + $0x10] ss:$8 sps:$4 sm:$0xff] (!%p449_p2)   ;;  %595 = vmatprep.mubr.bf16.mxu0 (!%p449_p2), %v1533_v4  ;;  %vm559_vm0 = vcmask (!%p449_p2), 261120  }
   0x7   : > { %564 = vmatpush1.bf16.msra.mxu0 (!%p449_p2), %v1487_v1  ;;  %612 = vmatprep.subr.bf16.mxu1 (!%p449_p2), %v1485_v0  ;;  %s1534_s17 = smov (!%p449_p2), 96   ;;  %s1535_s20 = smov (!%p449_p2), 64   ;;  %v1491_v9 = vld [vmem:[%s1777_s3] sm:$0xff] (!%p449_p2)   ;;  %v1536_v11 = vmov (!%p449_p2), 0.0   ;;  %v1493_v12 = vld [vmem:[%s1777_s3 + $0x8] sm:$0xff] (!%p449_p2)   ;;  %vm1537_vm1 = vmmov (!%p449_p2), 0  }
   0x8   : > { %565 = vmatprep.subr.bf16.mxu0 (!%p449_p2), %v1488_v2  ;;  %613 = vmatpush1.bf16.msra.mxu1 (!%p449_p2), %v1487_v1  ;;  %v1492_v10 = vld [vmem:[%s1778_s4] sm:$0xff] (!%p449_p2)   ;;  %v1494_v13 = vld [vmem:[%s1778_s4 + $0x8] sm:$0xff] (!%p449_p2)   ;;  %v1500_v44 = vld [vmem:[%s1780_s6 + $0x14] ss:$8 sps:$4 sm:$0xff] (!%p449_p2)   ;;  %v1713_v62 = vshrl.u32 (!%p449_p2), %v838_v61, 7  ;;  %vm946_vm4 = vcmask (!%p449_p2), 130048  }
   0x9   : > { %614 = vmatprep.subr.bf16.mxu1 (!%p449_p2), %v1488_v2  ;;  %644 = vmatprep.mubr.bf16.mxu1 (!%p449_p2), %v1533_v4  ;;  %v1497_v42 = vld [vmem:[%s1780_s6 + $0x4] ss:$8 sps:$4 sm:$0xff] (!%p449_p2)   ;;  %v1495_v43 = vld [vmem:[%s1780_s6] ss:$8 sps:$4 sm:$0xff] (!%p449_p2)   ;;  %v1498_v45 = vld [vmem:[%s1780_s6 + $0x10] ss:$8 sps:$4 sm:$0xff] (!%p449_p2)  }
   0xa   : > { %v1501_v46 = vld [vmem:[%s1782_s8] ss:$8 sps:$4 sm:$0xff] (!%p449_p2)   ;;  %v1503_v47 = vld [vmem:[%s1782_s8 + $0x4] ss:$8 sps:$4 sm:$0xff] (!%p449_p2)   ;;  %v840_v63 = vsub.s32 (!%p449_p2), 0, %v1713_v62  ;;  %vm1273_vm7 = vcmask (!%p449_p2), 31744  }
   0xb   : > { %566 = vmatpush1.bf16.msra.mxu0 (!%p449_p2), %v1490_v3  ;;  %v1407_v48 = vld [vmem:[%s1779_s5] ss:$0 sm:$0xff] (!%p449_p2)  ;;  %s1539_s25 = smov (!%p449_p2), 8   ;;  %vm1284_vm8 = vcmask (!%p449_p2), 64512   ;;  %vm1286_vm9 = vcmask (!%p449_p2), 97280  }
   0xc   : > { %658 = vmatprep.subr.bf16.mxu0 (!%p449_p2), %v1485_v0  ;;  %615 = vmatpush1.bf16.msra.mxu1 (!%p449_p2), %v1490_v3  ;;  %v538_v0 = vld [vmem:[%s1781_s7] sm:$0x3] (!%p449_p2) }
   0xd   : > { %s1791_s19 = smov (!%p502_p3, %s1384_s19), 1  ;;  %1441 = vmatprep.subr.bf16.mxu1 %v1536_v11 }
   0xe   : > { %s1389_s28 = sshll.u32 %s1791_s19, 2  ;;  %s1391_s21 = sshll.u32 %s1791_s19, 3 }
   0xf   : > { %s509_s16 = scalar_lea.vmem %s1775_s1, %s1389_s28  ;;  %s513_s24 = scalar_lea.vmem %s1788_s14, %s1391_s21 }
  0x10   : > { %v520_v5 = vld [vmem:[%s509_s16] sm:$0xf]  ;;  %s1538_s19 = smov 4   ;;  %s517_s29 = scalar_lea.vmem %s1789_s15, %s1391_s21 }
  0x11   : > { %v1398_v6 = vcombine.low %v520_v5, %v520_v5  ;;  %1397 = vmatmul.mubr.msk.bf16.vlgmr.msra.gmra.mrb[0].mxu0 %vm559_vm0, %v520_v5 }
  0x12   : > { %659 = vmatpush1.bf16.msra.mxu0 %v1487_v1  ;;  %690 = vmatprep.mubr.bf16.mxu0 %v1533_v4  ;;  %v844_v1 = vsub.s32 1, %v1713_v62 }
  0x13   : > { %607 = vrot.lane.b32.xlu0 %v1398_v6, %s1534_s17  ;;  %660 = vmatprep.subr.bf16.mxu0 %v1488_v2  ;;  %s505_s17 = scalar_lea.vmem %s1774_s0, %s1389_s28  ;;  %v841_v2 = vrot.slane %v538_v0, %v840_v63 }
  0x14   : > { %v519_v15 = vld [vmem:[%s505_s17] sm:$0xf] }
  0x16   : > { %661 = vmatpush1.bf16.msra.mxu0 %v1490_v3  ;;  %v845_v3 = vrot.slane %v538_v0, %v844_v1 }
  0x17   : > { %653 = vrot.lane.b32.xlu0 %v1398_v6, %s1535_s20  ;;  %1449 = vmatprep.subr.bf16.mxu0 %v1536_v11 }
  0x85   : > { %v608_v7 = vpop.permute.xlu0 %607 }
  0x86   : > { %1399 = vmatmul.mubr.msk.bf16.vlgmr.msra.gmra.mrb[0].mxu1 %vm559_vm0, %v608_v7 }
  0x87   : > { %1442 = vmatpush3.bf16.msra.mxu1 %v1492_v10  ;;  %1445 = vmatprep.mubr.msk.bf16.mxu1 %vm1537_vm1, %v1536_v11 }
  0x88   : > { %1443 = vmatprep.subr.bf16.mxu1 %v1536_v11 }
  0x89   : > { %v654_v8 = vpop.permute.xlu0 %653 }
  0x8a   : > { %1400 = vmatmul.mubr.msk.bf16.vlgmr.msra.gmra.mrb[4].mxu0 %vm559_vm0, %v654_v8 }
  0x8b   : > { %1450 = vmatpush3.bf16.msra.mxu0 %v1491_v9  ;;  %1453 = vmatprep.mubr.msk.bf16.mxu0 %vm1537_vm1, %v1536_v11 }
  0x8c   : > { %1451 = vmatprep.subr.bf16.mxu0 %v1536_v11  ;;  %1444 = vmatpush3.bf16.msra.mxu1 %v1494_v13 }
  0x8d   : > { %871 = vmatprep.subr.bf16.mxu1 %v1497_v42 }
  0x8f   : > { %1452 = vmatpush3.bf16.msra.mxu0 %v1493_v12 }
  0x90   : > { %950 = vmatprep.subr.bf16.mxu0 %v1503_v47 }
  0x92   : > { %1454 = vmatmul.mubr.msk.bf16.vlgmr.msra.gmra.mrb[8].mxu0 %vm559_vm0, %v519_v15 }
  0x93   : > { %982 = vmatprep.mubr.bf16.mxu0 %v1533_v4  ;;  %951 = vmatpush1.bf16.msra.mxu0 %v1501_v46 }
  0x94   : > { %1038 = vmatprep.subr.bf16.mxu0 %v1503_v47 }
  0xe4   : > { %v597_v14 = vpop.f32.mrb[0].mxu0 }
  0xe5   : > { %v1679_v16 = vpop.f32.mrb[1].mxu0  ;;  %v699_v20 = vmul.f32 %v597_v14, %v597_v14 }
  0xe6   : > { %v601_v17 = vpop.f32.mrb[2].mxu0 }
  0xe7   : > { %v602_v18 = vpop.f32.mrb[3].mxu0 }
 0x159   : > { %v646_v19 = vpop.f32.mrb[0].mxu1 }
 0x15a   : > { %v700_v21 = vmul.f32 %v646_v19, %v646_v19  ;;  %v1683_v22 = vpop.f32.mrb[1].mxu1 }
 0x15b   : > { %v650_v23 = vpop.f32.mrb[2].mxu1 }
 0x15c   : > { %v701_v24 = vadd.f32 %v700_v21, %v699_v20  ;;  %v651_v25 = vpop.f32.mrb[3].mxu1 }
 0x15d   : > { %v692_v26 = vpop.f32.mrb[4].mxu0  ;;  %v1505_v25 = vld [vmem:[%s1784_s10] sm:$0xff]  }
 0x15e   : > { %v702_v27 = vmul.f32 %v692_v26, %v692_v26  ;;  %v1685_v28 = vpop.f32.mrb[5].mxu0 }
 0x15f   : > { %v696_v29 = vpop.f32.mrb[6].mxu0 }
 0x160   : > { %v703_v30 = vadd.f32 %v702_v27, %v701_v24  ;;  %v697_v31 = vpop.f32.mrb[7].mxu0 }
 0x162   : > { %1509 = vrsqrt.f32 %v703_v30  ;;  %vm706_vm2 = vcmp.eq.f32.partialorder %v703_v30, inf  ;;  %v709_v34 = vand.u32 2147483648, %v703_v30  ;;  %vm708_vm3 = vcmp.eq.f32.partialorder %v703_v30, 0.0 }
 0x165   : > { %v816_v38 = vpop.f32.mrb[8].mxu0 }
 0x166   : > { %v1455_v39 = vpop.f32.mrb[9].mxu0 }
 0x167   : > { %v819_v40 = vpop.f32.mrb[10].mxu0 }
 0x168   : > { %v1456_v41 = vpop.f32.mrb[11].mxu0 }
 0x16c   : > { %v1510_v32 = vpop.eup %1509 }
 0x16d   : > { %v705_v33 = vmul.f32 %v1510_v32, %v703_v30 }
 0x16f   : > { %v707_v35 = vsel %vm706_vm2, %v703_v30, %v705_v33 }
 0x170   : > { %v710_v36 = vsel %vm708_vm3, %v709_v34, %v707_v35 }
 0x171   : > { %v711_v37 = vpack.c.bf16 %v710_v36, %v710_v36 }
 0x173   : > { %1446 = vmatmul.mubr.msk.bf16.vlgmr.msra.gmra.mrb[4].mxu1 %vm559_vm0, %v711_v37 }
 0x174   : > { %903 = vmatprep.mubr.bf16.mxu1 %v1533_v4  ;;  %872 = vmatpush1.bf16.msra.mxu1 %v1495_v43 }
 0x175   : > { %873 = vmatprep.subr.bf16.mxu1 %v1500_v44 }
 0x178   : > { %874 = vmatpush1.bf16.msra.mxu1 %v1498_v45 }
 0x179   : > { %994 = vmatprep.subr.bf16.mxu1 %v1503_v47 }
 0x246   : > { %v761_v49 = vpop.f32.mrb[4].mxu1 }
 0x247   : > { %v817_v50 = vadd.f32 %v816_v38, %v761_v49  ;;  %v1447_v51 = vpop.f32.mrb[5].mxu1 }
 0x248   : > { %v764_v52 = vpop.f32.mrb[6].mxu1 }
 0x249   : > { %v828_v53 = vadd.f32 %v1407_v48, %v817_v50  ;;  %v1448_v54 = vpop.f32.mrb[7].mxu1  ;;  %v1508_v52 = vld [vmem:[%s1786_s12 + $0x4] ss:$8 sps:$4 sm:$0xff]  }
 0x24a   : > { %v1424_v54 = vld [vmem:[%s1785_s11] ss:$0 sm:$0xff] }
 0x24b   : > { %v1408_v55 = vmul.f32 -1.442695, %v828_v53 }
 0x24d   : > { %1511 = vpow2.f32 %v1408_v55 }
 0x257   : > { %v1512_v56 = vpop.eup %1511 }
 0x258   : > { %v832_v57 = vadd.f32 1.0, %v1512_v56 }
 0x25a   : > { %1513 = vrcp.f32 %v832_v57 }
 0x264   : > { %v1514_v58 = vpop.eup %1513 }
 0x265   : > { %v835_v59 = vmul.f32 %v1514_v58, %v828_v53  ;;  %v1506_v53 = vld [vmem:[%s1786_s12] ss:$8 sps:$4 sm:$0xff]  }
 0x267   : > { %v836_v60 = vpack.c.bf16 %v835_v59, %v835_v59 }
 0x269   : > { %1413 = vmatmul.mubr.msk.bf16.vlgmr.msra.gmra.mrb[8].mxu1 %vm559_vm0, %v836_v60 }
 0x26a   : > { %995 = vmatpush1.bf16.msra.mxu1 %v1501_v46  ;;  %1026 = vmatprep.mubr.bf16.mxu1 %v1533_v4 }
 0x26b   : > { %1457 = vmatprep.subr.bf16.mxu1 %v1536_v11 }
 0x33c   : > { %v905_v5 = vpop.f32.mrb[8].mxu1 }
 0x33d   : > { %v906_v6 = vadd.f32 %v905_v5, %v841_v2  ;;  %v907_v7 = vpop.f32.mrb[9].mxu1 }
 0x33e   : > { %v908_v8 = vadd.f32 %v907_v7, %v845_v3  ;;  %v909_v9 = vpop.f32.mrb[10].mxu1 }
 0x33f   : > { %v1414_v10 = vmul.f32 -1.442695, %v906_v6  ;;  %v910_v12 = vpop.f32.mrb[11].mxu1 }
 0x340   : > { %v919_v13 = vmul.f32 %v908_v8, %v1679_v16  ;;  %v920_v14 = vmul.f32 %v908_v8, %v1683_v22  ;;  %v921_v15 = vmul.f32 %v908_v8, %v1685_v28  ;;  %v1504_v16 = vld [vmem:[%s1783_s9] sm:$0xff]  }
 0x341   : > { %1515 = vpow2.f32 %v1414_v10 }
 0x342   : > { %v923_v17 = vpack.c.bf16 %v919_v13, %v919_v13  ;;  %v924_v18 = vpack.c.bf16 %v920_v14, %v920_v14  ;;  %v925_v19 = vpack.c.bf16 %v921_v15, %v921_v15 }
 0x344   : > { %1417 = vmatmul.mubr.msk.bf16.vlgmr.msra.gmra.mrb[12].mxu0 %vm946_vm4, %v923_v17  ;;  %1418 = vmatmul.mubr.msk.bf16.vlgmr.msra.gmra.mrb[12].mxu1 %vm946_vm4, %v924_v18 }
 0x345   : > { %1039 = vmatpush1.bf16.msra.mxu0 %v1501_v46  ;;  %1070 = vmatprep.mubr.bf16.mxu0 %v1533_v4 }
 0x346   : > { %1463 = vmatprep.subr.bf16.mxu0 %v1536_v11  ;;  %1459 = vmatprep.mubr.msk.bf16.mxu1 %vm1537_vm1, %v1536_v11 }
 0x347   : > { %1458 = vmatpush3.bf16.msra.mxu1 %v1505_v25 }
 0x348   : > { %1229 = vmatprep.subr.bf16.mxu1 %v1508_v52 }
 0x34b   : > { %v1516_v20 = vpop.eup %1515 }
 0x34c   : > { %v915_v21 = vadd.f32 1.0, %v1516_v20  ;;  %1419 = vmatmul.mubr.msk.bf16.vlgmr.msra.gmra.mrb[16].mxu0 %vm946_vm4, %v925_v19 }
 0x34d   : > { %1464 = vmatpush3.bf16.msra.mxu0 %v1504_v16  ;;  %1465 = vmatprep.mubr.msk.bf16.mxu0 %vm1537_vm1, %v1536_v11 }
 0x34e   : > { %1517 = vrcp.f32 %v915_v21 }
 0x358   : > { %v1518_v22 = vpop.eup %1517 }
 0x359   : > { %v918_v23 = vmul.f32 %v1518_v22, %v906_v6  ;;  %v935_v6 = vld [vmem:[%s1787_s13] sm:$0x3] }
 0x35a   : > { %v1209_v7 = vrot.slane %v935_v6, %v840_v63  ;;  %v1213_v8 = vrot.slane %v935_v6, %v844_v1 }
 0x35b   : > { %v922_v24 = vpack.c.bf16 %v918_v23, %v918_v23 }
 0x35d   : > { %1466 = vmatmul.mubr.msk.bf16.vlgmr.msra.gmra.mrb[20].mxu0 %vm946_vm4, %v922_v24 }
 0x417   : > { %v984_v26 = vpop.f32.mrb[12].mxu0  ;;  %v1028_v27 = vpop.f32.mrb[12].mxu1 }
 0x418   : > { %v1079_v28 = vmul.f32 %v984_v26, %v984_v26  ;;  %v1080_v29 = vmul.f32 %v1028_v27, %v1028_v27  ;;  %v986_v30 = vpop.f32.mrb[13].mxu0  ;;  %v1030_v31 = vpop.f32.mrb[13].mxu1 }
 0x419   : > { %v988_v32 = vpop.f32.mrb[14].mxu0  ;;  %v1032_v33 = vpop.f32.mrb[14].mxu1 }
 0x41a   : > { %v1081_v11 = vadd.f32 %v1080_v29, %v1079_v28  ;;  %v989_v34 = vpop.f32.mrb[15].mxu0  ;;  %v1033_v35 = vpop.f32.mrb[15].mxu1 }
 0x41f   : > { %v1072_v36 = vpop.f32.mrb[16].mxu0 }
 0x420   : > { %v1082_v37 = vmul.f32 %v1072_v36, %v1072_v36  ;;  %v1074_v38 = vpop.f32.mrb[17].mxu0 }
 0x421   : > { %v1076_v39 = vpop.f32.mrb[18].mxu0 }
 0x422   : > { %v1083_v40 = vadd.f32 %v1082_v37, %v1081_v11  ;;  %v1077_v41 = vpop.f32.mrb[19].mxu0 }
 0x424   : > { %1519 = vrsqrt.f32 %v1083_v40  ;;  %vm1086_vm5 = vcmp.eq.f32.partialorder %v1083_v40, inf  ;;  %v1089_v45 = vand.u32 2147483648, %v1083_v40  ;;  %vm1088_vm6 = vcmp.eq.f32.partialorder %v1083_v40, 0.0 }
 0x42e   : > { %v1520_v42 = vpop.eup %1519 }
 0x42f   : > { %v1085_v43 = vmul.f32 %v1520_v42, %v1083_v40 }
 0x430   : > { %v1184_v44 = vpop.f32.mrb[20].mxu0 }
 0x431   : > { %v1467_v46 = vpop.f32.mrb[21].mxu0  ;;  %v1087_v47 = vsel %vm1086_vm5, %v1083_v40, %v1085_v43 }
 0x432   : > { %v1187_v48 = vpop.f32.mrb[22].mxu0  ;;  %v1090_v49 = vsel %vm1088_vm6, %v1089_v45, %v1087_v47 }
 0x433   : > { %v1468_v50 = vpop.f32.mrb[23].mxu0  ;;  %v1091_v51 = vpack.c.bf16 %v1090_v49, %v1090_v49 }
 0x435   : > { %1460 = vmatmul.mubr.msk.bf16.vlgmr.msra.gmra.mrb[16].mxu1 %vm946_vm4, %v1091_v51 }
 0x436   : > { %1261 = vmatprep.mubr.bf16.mxu1 %v1533_v4  ;;  %1230 = vmatpush1.bf16.msra.mxu1 %v1506_v53 }
 0x508   : > { %v1135_v55 = vpop.f32.mrb[16].mxu1 }
 0x509   : > { %v1185_v56 = vadd.f32 %v1184_v44, %v1135_v55  ;;  %v1461_v57 = vpop.f32.mrb[17].mxu1 }
 0x50a   : > { %v1138_v58 = vpop.f32.mrb[18].mxu1 }
 0x50b   : > { %v1196_v4 = vadd.f32 %v1424_v54, %v1185_v56  ;;  %v1462_v59 = vpop.f32.mrb[19].mxu1 }
 0x50d   : > { %v1425_v60 = vmul.f32 -1.442695, %v1196_v4 }
 0x50f   : > { %1521 = vpow2.f32 %v1425_v60 }
 0x519   : > { %v1522_v61 = vpop.eup %1521 }
 0x51a   : > { %v1200_v0 = vadd.f32 1.0, %v1522_v61 }
 0x51c   : > { %1523 = vrcp.f32 %v1200_v0 }
 0x526   : > { %v1524_v2 = vpop.eup %1523 }
 0x527   : > { %v1203_v3 = vmul.f32 %v1524_v2, %v1196_v4 }
 0x529   : > { %v1204_v5 = vpack.c.bf16 %v1203_v3, %v1203_v3 }
 0x52b   : > { %1428 = vmatmul.mubr.msk.bf16.vlgmr.msra.gmra.mrb[20].mxu1 %vm946_vm4, %v1204_v5 }
 0x5fe   : > { %v1263_v9 = vpop.f32.mrb[20].mxu1 }
 0x5ff   : > { %v1264_v10 = vadd.f32 %v1263_v9, %v1209_v7  ;;  %v1265_v12 = vpop.f32.mrb[21].mxu1 }
 0x600   : > { %v1266_v13 = vadd.f32 %v1265_v12, %v1213_v8  ;;  %v1267_v14 = vpop.f32.mrb[22].mxu1 }
 0x601   : > { %v1268_v15 = vpop.f32.mrb[23].mxu1  ;;  %1274 = vst.msk [vmem:[%s513_s24] sm:$0xff] %vm1273_vm7, %v1264_v10 }
 0x602   : > { %v1270_v17 = vmul.f32 %v1266_v13, %v986_v30  ;;  %v1271_v18 = vmul.f32 %v1266_v13, %v1030_v31  ;;  %v1272_v16 = vmul.f32 %v1266_v13, %v1074_v38 }
 0x604   : > { %1276 = vrot.lane.b32.xlu1 %v1271_v18, %s1538_s19 }
 0x608   : > { %1280 = vrot.lane.b32.xlu1 %v1272_v16, %s1539_s25 }
 0x676   : > { %v1277_v62 = vpop.permute.xlu1 %1276 }
 0x677   : > { %v1283_v63 = vsel %vm1273_vm7, %v1270_v17, %v1277_v62 }
 0x67a   : > { %v1281_v1 = vpop.permute.xlu1 %1280 }
 0x67b   : > { %v1285_v19 = vsel %vm1284_vm8, %v1283_v63, %v1281_v1 }
 0x67c   : > { %1287 = vst.msk [vmem:[%s517_s29] sm:$0xff] %vm1286_vm9, %v1285_v19 }
 0x67d PF: > { %s26_s18 = sadd.s32 1, %s1531_s18  }
 0x67e   : > { %p23_p4 = scmp.ge.s32.totalorder %s26_s18, 4  }
 0x680   :  { %25 = sbr.rel (!%p23_p4) target bundleno = 1 (0x1), region = 121 }

</bundles_post_ra>
